<compile_context>
chip_gen: v5e
topology: v5e:2x2
jax: 0.10.0
libtpu: 0.0.40
codegen_flags: <defaults>
</compile_context>

<pallas_src>
import jax
import jax.numpy as jnp
from jax.experimental import pallas as pl
from jax.experimental.pallas import tpu as pltpu


def mlp_kernel(x_ref, w1_ref, b1_ref, w2_ref, b2_ref, o_ref):
    # x: [TB, d_in]   w1: [d_hidden, d_in]   b1: [d_hidden, 1]
    # w2: [d_out, d_hidden]   b2: [1, d_out]   out: [TB, d_out]
    x = x_ref[...]

    # hT = W1 @ x^T : contract d_in on the last dim of both operands (A.B^T),
    # putting the batch on the lane / MXU-N axis.
    hT = jax.lax.dot_general(
        w1_ref[...], x,
        dimension_numbers=(((1,), (1,)), ((), ())),
        preferred_element_type=jnp.float32)                 # [d_hidden, TB]
    hT = jax.nn.sigmoid(hT + b1_ref[...])                   # lane-dense EUP logistic

    # Bring the batch back to the sublane axis with a (8,128)-aligned transpose
    # (XLU slot is otherwise idle), then out = h @ W2^T (A.B^T again).
    h = hT.T                                                # [TB, d_hidden]
    out = jax.lax.dot_general(
        h, w2_ref[...],
        dimension_numbers=(((1,), (1,)), ((), ())),
        preferred_element_type=jnp.float32)                 # [TB, d_out]

    o_ref[...] = (out + b2_ref[...]).astype(o_ref.dtype)


def _round_up(n, m):
    return ((n + m - 1) // m) * m


def mlp_forward(x, w1, b1, w2, b2, *, tb=4096):
    """x: [B, d_in]; w1: [d_hidden, d_in]; b1: [d_hidden];
       w2: [d_out, d_hidden]; b2: [d_out]  (PyTorch Linear layouts)."""
    batch, d_in = x.shape
    d_hidden = w1.shape[0]
    d_out = w2.shape[0]

    # Tile selection:
    #  * large default (4096) to amortize per-step pipeline overhead,
    #  * capped at ~half the batch (rounded to 128) so big batches keep >= 2
    #    grid steps for the v7x megacore "parallel" split,
    #  * clamped for tiny batches (multiple of 8 for the sublane constraint).
    half = -(-batch // 2)
    tb_eff = min(tb, max(128, _round_up(half, 128)))
    tb_eff = max(8, min(tb_eff, _round_up(batch, 8)))
    n_tiles = pl.cdiv(batch, tb_eff)

    b1c = b1.reshape(d_hidden, 1)   # broadcasts over the lane (batch) axis
    b2r = b2.reshape(1, d_out)      # broadcasts over the sublane (batch) axis

    return pl.pallas_call(
        mlp_kernel,
        out_shape=jax.ShapeDtypeStruct((batch, d_out), x.dtype),
        grid=(n_tiles,),
        in_specs=[
            pl.BlockSpec((tb_eff, d_in), lambda i: (i, 0)),   # x tile, pipelined
            pl.BlockSpec(w1.shape, lambda i: (0, 0)),         # resident weights
            pl.BlockSpec(b1c.shape, lambda i: (0, 0)),
            pl.BlockSpec(w2.shape, lambda i: (0, 0)),
            pl.BlockSpec(b2r.shape, lambda i: (0, 0)),
        ],
        out_specs=pl.BlockSpec((tb_eff, d_out), lambda i: (i, 0)),
        compiler_params=pltpu.CompilerParams(
            dimension_semantics=("parallel",)),               # 2 TCs on v7x
    )(x, w1, b1c, w2, b2r)


def reference_forward(x, w1, b1, w2, b2):
    h = jax.nn.sigmoid(x @ w1.T + b1)
    return h @ w2.T + b2


if __name__ == "__main__":
    key = jax.random.PRNGKey(0)
    k_x, k_w1, k_b1, k_w2, k_b2, k_x2 = jax.random.split(key, 6)

    d_in, d_hidden, d_out = 4, 8, 3

    # Deterministic parameters in PyTorch Linear layout: W [out, in], b [out].
    bound1 = 1.0 / (d_in ** 0.5)
    bound2 = 1.0 / (d_hidden ** 0.5)
    w1 = jax.random.uniform(k_w1, (d_hidden, d_in), jnp.float32, -bound1, bound1)
    b1 = jax.random.uniform(k_b1, (d_hidden,), jnp.float32, -bound1, bound1)
    w2 = jax.random.uniform(k_w2, (d_out, d_hidden), jnp.float32, -bound2, bound2)
    b2 = jax.random.uniform(k_b2, (d_out,), jnp.float32, -bound2, bound2)

    # Small batch: non-multiple of 128 -> exercises ragged last block + 2 grid steps.
    batch = 200
    x = jax.random.normal(k_x, (batch, d_in), dtype=jnp.float32)
    out = mlp_forward(x, w1, b1, w2, b2)
    jax.block_until_ready(out)
    ref = reference_forward(x, w1, b1, w2, b2)
    assert out.shape == (batch, d_out)
    assert jnp.allclose(out, ref, atol=1e-5, rtol=1e-5)

    # Larger batch: exercises the big (4096-row) tile path, an odd ragged tail,
    # and multiple "parallel" grid steps.
    batch2 = 8250
    x2 = jax.random.normal(k_x2, (batch2, d_in), dtype=jnp.float32)
    out2 = mlp_forward(x2, w1, b1, w2, b2)
    jax.block_until_ready(out2)
    ref2 = reference_forward(x2, w1, b1, w2, b2)
    assert out2.shape == (batch2, d_out)
    assert jnp.allclose(out2, ref2, atol=1e-5, rtol=1e-5)

    print("KERNEL_OK")
</pallas_src>

<mosaic_0001>
module attributes {stable_mosaic.version = 11 : i64} {
  func.func @mlp_kernel(%arg0: i32, %arg1: memref<128x4xf32, #tpu.memory_space<vmem>>, %arg2: memref<8x4xf32, #tpu.memory_space<vmem>>, %arg3: memref<8x1xf32, #tpu.memory_space<vmem>>, %arg4: memref<3x8xf32, #tpu.memory_space<vmem>>, %arg5: memref<1x3xf32, #tpu.memory_space<vmem>>, %arg6: memref<128x3xf32, #tpu.memory_space<vmem>>) attributes {dimension_semantics = [#tpu.dimension_semantics<parallel>], iteration_bounds = array<i64: 2>, scalar_prefetch = 0 : i64, scratch_operands = 0 : i64, tpu.core_type = #tpu.core_type<tc>, window_params = [{transform_indices = @transform_0, window_bounds = array<i64: 128, 4>}, {pipeline_mode = #tpu.pipeline_mode<synchronous>, transform_indices = @transform_1, window_bounds = array<i64: 8, 4>}, {pipeline_mode = #tpu.pipeline_mode<synchronous>, transform_indices = @transform_2, window_bounds = array<i64: 8, 1>}, {pipeline_mode = #tpu.pipeline_mode<synchronous>, transform_indices = @transform_3, window_bounds = array<i64: 3, 8>}, {pipeline_mode = #tpu.pipeline_mode<synchronous>, transform_indices = @transform_4, window_bounds = array<i64: 1, 3>}, {transform_indices = @transform_5, window_bounds = array<i64: 128, 3>}]} {
    %c0 = arith.constant 0 : index
    %c0_0 = arith.constant 0 : index
    %0 = vector.load %arg1[%c0, %c0_0] : memref<128x4xf32, #tpu.memory_space<vmem>>, vector<128x4xf32>
    %c0_1 = arith.constant 0 : index
    %c0_2 = arith.constant 0 : index
    %1 = vector.load %arg2[%c0_1, %c0_2] : memref<8x4xf32, #tpu.memory_space<vmem>>, vector<8x4xf32>
    %cst = arith.constant dense<0.000000e+00> : vector<8x128xf32>
    %2 = tpu.matmul %1, %0, %cst {dimension_numbers = #tpu.dot_dimension_numbers<[1], [1], [0], [0], [0, 0, 1, 0], [], []>} : vector<8x4xf32>, vector<128x4xf32>, vector<8x128xf32> -> vector<8x128xf32>
    %c0_3 = arith.constant 0 : index
    %c0_4 = arith.constant 0 : index
    %3 = vector.load %arg3[%c0_3, %c0_4] : memref<8x1xf32, #tpu.memory_space<vmem>>, vector<8x1xf32>
    %4 = vector.broadcast %3 : vector<8x1xf32> to vector<8x128xf32>
    %5 = arith.addf %2, %4 : vector<8x128xf32>
    %6 = arith.negf %5 : vector<8x128xf32>
    %7 = math.exp %6 : vector<8x128xf32>
    %cst_5 = arith.constant 1.000000e+00 : f32
    %8 = vector.broadcast %cst_5 : f32 to vector<8x128xf32>
    %9 = arith.addf %8, %7 : vector<8x128xf32>
    %10 = arith.divf %8, %9 : vector<8x128xf32>
    %11 = tpu.transpose %10, [1, 0] : vector<8x128xf32> -> vector<128x8xf32>
    %c0_6 = arith.constant 0 : index
    %c0_7 = arith.constant 0 : index
    %12 = vector.load %arg4[%c0_6, %c0_7] : memref<3x8xf32, #tpu.memory_space<vmem>>, vector<3x8xf32>
    %cst_8 = arith.constant dense<0.000000e+00> : vector<128x3xf32>
    %13 = tpu.matmul %11, %12, %cst_8 {dimension_numbers = #tpu.dot_dimension_numbers<[1], [1], [0], [0], [0, 0, 1, 0], [], []>} : vector<128x8xf32>, vector<3x8xf32>, vector<128x3xf32> -> vector<128x3xf32>
    %c0_9 = arith.constant 0 : index
    %c0_10 = arith.constant 0 : index
    %14 = vector.load %arg5[%c0_9, %c0_10] : memref<1x3xf32, #tpu.memory_space<vmem>>, vector<1x3xf32>
    %15 = vector.broadcast %14 : vector<1x3xf32> to vector<128x3xf32>
    %16 = arith.addf %13, %15 : vector<128x3xf32>
    %c0_11 = arith.constant 0 : index
    %c0_12 = arith.constant 0 : index
    %17 = vector.load %arg6[%c0_11, %c0_12] : memref<128x3xf32, #tpu.memory_space<vmem>>, vector<128x3xf32>
    tpu.vector_store %arg6[%c0_11, %c0_12], %16 {strides = array<i32>} : memref<128x3xf32, #tpu.memory_space<vmem>>, vector<128x3xf32>,
    return
  }
  func.func @transform_0(%arg0: i32) -> (i32, i32) {
    %c0_i32 = arith.constant 0 : i32
    %c0_i32_0 = arith.constant 0 : i32
    return %arg0, %c0_i32 : i32, i32
  }
  func.func @transform_1(%arg0: i32) -> (i32, i32) {
    %c0_i32 = arith.constant 0 : i32
    %c0_i32_0 = arith.constant 0 : i32
    %c0_i32_1 = arith.constant 0 : i32
    return %c0_i32, %c0_i32_0 : i32, i32
  }
  func.func @transform_2(%arg0: i32) -> (i32, i32) {
    %c0_i32 = arith.constant 0 : i32
    %c0_i32_0 = arith.constant 0 : i32
    %c0_i32_1 = arith.constant 0 : i32
    return %c0_i32, %c0_i32_0 : i32, i32
  }
  func.func @transform_3(%arg0: i32) -> (i32, i32) {
    %c0_i32 = arith.constant 0 : i32
    %c0_i32_0 = arith.constant 0 : i32
    %c0_i32_1 = arith.constant 0 : i32
    return %c0_i32, %c0_i32_0 : i32, i32
  }
  func.func @transform_4(%arg0: i32) -> (i32, i32) {
    %c0_i32 = arith.constant 0 : i32
    %c0_i32_0 = arith.constant 0 : i32
    %c0_i32_1 = arith.constant 0 : i32
    return %c0_i32, %c0_i32_0 : i32, i32
  }
  func.func @transform_5(%arg0: i32) -> (i32, i32) {
    %c0_i32 = arith.constant 0 : i32
    %c0_i32_0 = arith.constant 0 : i32
    return %arg0, %c0_i32 : i32, i32
  }
}

</mosaic_0001>

<bundles_post_ra>
// kernel: tpu_custom_call.1
= control target key start
LH: loop header
LB: loop body
LE: loop exit
PB: predicated region body
PF: predicated region fallthrough
CT: control target
= control target key end

     0   :  { %s1086_s18 = smov 0   ;;  %s1088_s19 = smov 0   ;;  %s1328_s0 = inlined_call_operand.vmem [shape: f32[200,4], index: 0, kind: input, shape index: {}]   ;;  %s1329_s1 = inlined_call_operand.vmem [shape: f32[8,4], index: 1, kind: input, shape index: {}]   ;;  %s1330_s2 = inlined_call_operand.vmem [shape: f32[8,1], index: 2, kind: input, shape index: {}]   ;;  %s1331_s3 = inlined_call_operand.vmem [shape: f32[3,8], index: 3, kind: input, shape index: {}]   ;;  %s1332_s4 = inlined_call_operand.vmem [shape: f32[1,3], index: 4, kind: input, shape index: {}]   ;;  %s1333_s5 = inlined_call_operand.vmem [shape: f32[200,3], index: 5, kind: output, shape index: {}]  }
   0x1   :  { %s1090_s20 = smov 0  }
   0x2 LB: > { %s1099_s21 = sadd.s32 4294967295, %s1021_s20   ;;  %s1101_s22 = sadd.s32 1, %s1021_s20   ;;  %s1021_s20 = sphi %s1090_s20, %s1342_s20   ;;  %s1017_s19 = sphi %s1088_s19, %s1341_s19   ;;  %s1013_s18 = sphi %s1086_s18, %s1340_s18  }
   0x3   : > { %s129_s23 = ssub.s32 %s1021_s20, %s1101_s22  ;;  %s132_s24 = sadd.s32 1, %s1017_s19 }
   0x4   : > { %p130_p0 = scmp.eq.s32.totalorder %s129_s23, 0  ;;  %p142_p1 = scmp.ne.s32.totalorder %s1017_s19, %s1013_s18 }
   0x5   : > { %p143_p2 = scmp.eq.s32.totalorder %s1099_s21, 1  ;;  %p810_p3 = scmp.ge.s32.totalorder %s1021_s20, 1 }
   0x6   : > { %s1109_s25 = scalar_select %p130_p0, %s1017_s19, %s132_s24  }
   0x7   : > { %p1111_p4 = por %p143_p2, %p142_p1  ;;  %p196_p5 = scmp.lt.s32.totalorder %s1021_s20, 3 }
   0x9   : > { %p197_p6 = pnand %p810_p3, %p196_p5 }
   0xa   : > { %s1116_s27 = sshll.u32 (!%p197_p6), %s1099_s21, 4  ;;  %s224_s14 = sand.u32 (!%p197_p6), 1, %s1013_s18  }
   0xb   : > { %200 = sbr.rel (%p197_p6) target bundleno = 708 (0x2c4), region = 40  ;;  %p232_p7 = scmp.lt.s32.totalorder (!%p197_p6), %s1116_s27, 24 }
   0xc   : > { %s811_s15 = sshll.u32 (!%p197_p6), %s224_s14, 7 }
   0xd   : > { %s1190_s20 = scalar_lea.vmem (!%p197_p6), [#allocation2], %s811_s15  }
  0x10   : > { %s233_s28 = scalar_select %p232_p7, %s1116_s27, 24  ;;  %vm269_vm0 = vcmask 31744   ;;  %v263_v9 = vld [vmem:[%s1330_s2] sm:$0xff]  ;;  %v1055_v10 = vmov 0   ;;  %vm397_vm1 = vcmask 64512   ;;  %vm514_vm6 = vcmask 23552  }
  0x11   : > { %961 = vset.pattern.permute.xlu0 %v1055_v10  ;;  %v262_v18 = vld [vmem:[%s1329_s1] sm:$0xff]  ;;  %s539_s18 = ssub.s32 (%p1111_p4), 25, %s1116_s27  ;;  %s866_s23 = sshll.u32 (%p1111_p4), %s1099_s21, 7 }
  0x12   : > { %s813_s29 = sshll.u32 %s233_s28, 3  ;;  %266 = vperm.xlu0 %961, %v263_v9   ;;  %v392_v20 = vld [vmem:[%s1331_s3] sm:$0x7]  ;;  %p540_p8 = scmp.lt.s32.totalorder (%p1111_p4), %s539_s18, 16 }
  0x13   : > { %s1123_s7 = scalar_lea.vmem %s1328_s0, %s813_s29  ;;  %832 = vmatpush.xpose.msk.msra.mxu1 %vm397_vm1, %v392_v20  ;;  %869 = vmatpush.xpose.msk.msra.mxu2 %vm397_vm1, %v392_v20  ;;  %v962_v52 = vld [vmem:[%s1332_s4] ss:$0 sm:$0xff]  ;;  %s1231_s29 = scalar_lea.vmem (%p1111_p4), %s1333_s5, %s866_s23  }
  0x14   : > { %v261_v0 = vld [vmem:[%s1123_s7 + $0x78] sm:$0xff]  ;;  %v260_v1 = vld [vmem:[%s1123_s7 + $0x70] sm:$0xff]  ;;  %v259_v2 = vld [vmem:[%s1123_s7 + $0x68] sm:$0xff]  ;;  %870 = vmatpush.xpose.msk.msra.mxu3 %vm397_vm1, %v392_v20 }
  0x15   : > { %814 = vmatpush.xpose.msk.msra.mxu0 %vm269_vm0, %v261_v0  ;;  %v258_v3 = vld [vmem:[%s1123_s7 + $0x60] sm:$0xff]  ;;  %v257_v4 = vld [vmem:[%s1123_s7 + $0x58] sm:$0xff]  ;;  %v256_v5 = vld [vmem:[%s1123_s7 + $0x50] sm:$0xff] }
  0x16   : > { %v255_v6 = vld [vmem:[%s1123_s7 + $0x48] sm:$0xff]  ;;  %v254_v7 = vld [vmem:[%s1123_s7 + $0x40] sm:$0xff]  ;;  %v253_v8 = vld [vmem:[%s1123_s7 + $0x38] sm:$0xff] }
  0x17   : > { %v252_v11 = vld [vmem:[%s1123_s7 + $0x30] sm:$0xff]  ;;  %v251_v12 = vld [vmem:[%s1123_s7 + $0x28] sm:$0xff]  ;;  %v250_v13 = vld [vmem:[%s1123_s7 + $0x20] sm:$0xff] }
  0x18   : > { %v249_v14 = vld [vmem:[%s1123_s7 + $0x18] sm:$0xff]  ;;  %v248_v15 = vld [vmem:[%s1123_s7 + $0x10] sm:$0xff]  ;;  %v247_v16 = vld [vmem:[%s1123_s7 + $0x8] sm:$0xff] }
  0x19   : > { %815 = vmatpush.xpose.msk.msra.mxu0 %vm269_vm0, %v260_v1  ;;  %v246_v17 = vld [vmem:[%s1123_s7] sm:$0xff] }
  0x1d   : > { %816 = vmatpush.xpose.msk.msra.mxu0 %vm269_vm0, %v259_v2 }
  0x21   : > { %817 = vmatpush.xpose.msk.msra.mxu0 %vm269_vm0, %v258_v3 }
  0x25   : > { %818 = vmatpush.xpose.msk.msra.mxu0 %vm269_vm0, %v257_v4 }
  0x29   : > { %819 = vmatpush.xpose.msk.msra.mxu0 %vm269_vm0, %v256_v5 }
  0x2d   : > { %820 = vmatpush.xpose.msk.msra.mxu0 %vm269_vm0, %v255_v6 }
  0x31   : > { %821 = vmatpush.xpose.msk.msra.mxu0 %vm269_vm0, %v254_v7 }
  0x35   : > { %822 = vmatpush.xpose.msk.msra.mxu0 %vm269_vm0, %v253_v8 }
  0x39   : > { %823 = vmatpush.xpose.msk.msra.mxu0 %vm269_vm0, %v252_v11 }
  0x3d   : > { %824 = vmatpush.xpose.msk.msra.mxu0 %vm269_vm0, %v251_v12 }
  0x41   : > { %825 = vmatpush.xpose.msk.msra.mxu0 %vm269_vm0, %v250_v13 }
  0x45   : > { %826 = vmatpush.xpose.msk.msra.mxu0 %vm269_vm0, %v249_v14 }
  0x49   : > { %827 = vmatpush.xpose.msk.msra.mxu0 %vm269_vm0, %v248_v15 }
  0x4d   : > { %828 = vmatpush.xpose.msk.msra.mxu0 %vm269_vm0, %v247_v16 }
  0x51   : > { %829 = vmatpush.xpose.msk.msra.mxu0 %vm269_vm0, %v246_v17 }
  0x54   : > { %830 = vmatmul.msk.f32.vlgmr.msra.gmra.mxu0 %vm269_vm0, %v262_v18 }
  0x84   : > { %v267_v19 = vpop.permute.xlu0 %266 }
  0xd1   : > { %v338_v21 = vpop.f32.mrf.mxu0 }
  0xd2   : > { %v339_v22 = vadd.f32 %v338_v21, %v267_v19 }
  0xd4   : > { %v831_v23 = vmul.f32 -1.442695, %v339_v22 }
  0xd6   : > { %963 = vpow2.f32 %v831_v23 }
  0xdc   : > { %v964_v24 = vpop.eup %963 }
  0xdd   : > { %v344_v25 = vadd.f32 1.0, %v964_v24 }
  0xdf   : > { %965 = vrcp.f32 %v344_v25  ;;  %v356_v29 = vand.u32 2147483648, %v344_v25  ;;  %v354_v31 = vand.u32 2147483647, %v344_v25  ;;  %vm350_vm3 = vweird.f32 %v344_v25 }
  0xe1   : > { %v357_v33 = vor.u32 1.1754944e-38, %v356_v29  ;;  %vm355_vm5 = vcmp.eq.f32.partialorder %v354_v31, 8.507059e+37 }
  0xe5   : > { %v966_v26 = vpop.eup %965 }
  0xe6   : > { %v346_v27 = vmul.f32 %v966_v26, %v344_v25  ;;  %vm351_vm2 = vweird.f32 %v966_v26 }
  0xe7   : > { %vm352_vm4 = vmor %vm350_vm3, %vm351_vm2 }
  0xe8   : > { %v347_v28 = vsub.f32 1.0, %v346_v27 }
  0xea   : > { %v348_v30 = vmul.f32 %v966_v26, %v347_v28 }
  0xec   : > { %v349_v32 = vadd.f32 %v966_v26, %v348_v30 }
  0xee   : > { %v353_v34 = vsel %vm352_vm4, %v966_v26, %v349_v32 }
  0xef   : > { %v358_v35 = vsel %vm355_vm5, %v357_v33, %v353_v34 }
  0xf0   : > { %360 = vxpose.xlu0.b32.start.end [1/1] (short) %v358_v35, 128 }
 0x194   : > { %v376_v36 = vpop.trf.xlu0 }
 0x195   : > { %833 = vmatmul.msk.f32.vlgmr.msra.gmra.mxu1 %vm397_vm1, %v376_v36 }
 0x19c   : > { %v377_v37 = vpop.trf.xlu0 }
 0x19d   : > { %834 = vmatmul.msk.f32.gmra.mxu1 %vm397_vm1, %v377_v37 }
 0x1a4   : > { %v378_v38 = vpop.trf.xlu0 }
 0x1a5   : > { %835 = vmatmul.msk.f32.gmra.mxu1 %vm397_vm1, %v378_v38 }
 0x1ac   : > { %v379_v39 = vpop.trf.xlu0 }
 0x1ad   : > { %836 = vmatmul.msk.f32.gmra.mxu1 %vm397_vm1, %v379_v39 }
 0x1b4   : > { %v380_v40 = vpop.trf.xlu0 }
 0x1b5   : > { %837 = vmatmul.msk.f32.gmra.mxu1 %vm397_vm1, %v380_v40 }
 0x1bc   : > { %v381_v41 = vpop.trf.xlu0 }
 0x1bd   : > { %838 = vmatmul.msk.f32.gmra.mxu1 %vm397_vm1, %v381_v41 }
 0x1c4   : > { %v382_v42 = vpop.trf.xlu0 }
 0x1c5   : > { %839 = vmatmul.msk.f32.vlgmr.msra.gmra.mxu2 %vm397_vm1, %v382_v42 }
 0x1cc   : > { %v383_v43 = vpop.trf.xlu0 }
 0x1cd   : > { %840 = vmatmul.msk.f32.gmra.mxu2 %vm397_vm1, %v383_v43 }
 0x1d4   : > { %v384_v44 = vpop.trf.xlu0 }
 0x1d5   : > { %841 = vmatmul.msk.f32.gmra.mxu2 %vm397_vm1, %v384_v44 }
 0x1dc   : > { %v385_v45 = vpop.trf.xlu0 }
 0x1dd   : > { %842 = vmatmul.msk.f32.gmra.mxu2 %vm397_vm1, %v385_v45 }
 0x1e4   : > { %v386_v46 = vpop.trf.xlu0 }
 0x1e5   : > { %843 = vmatmul.msk.f32.gmra.mxu2 %vm397_vm1, %v386_v46 }
 0x1ec   : > { %v387_v47 = vpop.trf.xlu0 }
 0x1ed   : > { %844 = vmatmul.msk.f32.gmra.mxu2 %vm397_vm1, %v387_v47 }
 0x1f4   : > { %v388_v48 = vpop.trf.xlu0 }
 0x1f5   : > { %845 = vmatmul.msk.f32.gmra.mxu2 %vm397_vm1, %v388_v48 }
 0x1fc   : > { %v389_v49 = vpop.trf.xlu0 }
 0x1fd   : > { %846 = vmatmul.msk.f32.vlgmr.msra.gmra.mxu3 %vm397_vm1, %v389_v49 }
 0x204   : > { %v390_v50 = vpop.trf.xlu0 }
 0x205   : > { %847 = vmatmul.msk.f32.gmra.mxu3 %vm397_vm1, %v390_v50 }
 0x20c   : > { %v391_v51 = vpop.trf.xlu0 }
 0x20d   : > { %848 = vmatmul.msk.f32.gmra.mxu3 %vm397_vm1, %v391_v51 }
 0x212   : > { %v466_v53 = vpop.f32.mrf.mxu1 }
 0x213   : > { %v467_v54 = vadd.f32 %v962_v52, %v466_v53 }
 0x215   : > { %515 = vst.msk [vmem:[%s1190_s20] sm:$0xff] %vm514_vm6, %v467_v54 }
 0x21a   : > { %v469_v55 = vpop.f32.mrf.mxu1 }
 0x21b   : > { %v470_v56 = vadd.f32 %v962_v52, %v469_v55 }
 0x21d   : > { %516 = vst.msk [vmem:[%s1190_s20 + $0x8] sm:$0xff] %vm514_vm6, %v470_v56 }
 0x222   : > { %v472_v57 = vpop.f32.mrf.mxu1 }
 0x223   : > { %v473_v58 = vadd.f32 %v962_v52, %v472_v57 }
 0x225   : > { %517 = vst.msk [vmem:[%s1190_s20 + $0x10] sm:$0xff] %vm514_vm6, %v473_v58 }
 0x22a   : > { %v475_v59 = vpop.f32.mrf.mxu1 }
 0x22b   : > { %v476_v60 = vadd.f32 %v962_v52, %v475_v59 }
 0x22d   : > { %518 = vst.msk [vmem:[%s1190_s20 + $0x18] sm:$0xff] %vm514_vm6, %v476_v60 }
 0x232   : > { %v478_v61 = vpop.f32.mrf.mxu1 }
 0x233   : > { %v479_v62 = vadd.f32 %v962_v52, %v478_v61 }
 0x235   : > { %519 = vst.msk [vmem:[%s1190_s20 + $0x20] sm:$0xff] %vm514_vm6, %v479_v62 }
 0x23a   : > { %v481_v63 = vpop.f32.mrf.mxu1 }
 0x23b   : > { %v482_v0 = vadd.f32 %v962_v52, %v481_v63 }
 0x23d   : > { %520 = vst.msk [vmem:[%s1190_s20 + $0x28] sm:$0xff] %vm514_vm6, %v482_v0 }
 0x248   : > { %v484_v1 = vpop.f32.mrf.mxu2 }
 0x249   : > { %v485_v2 = vadd.f32 %v962_v52, %v484_v1 }
 0x24b   : > { %521 = vst.msk [vmem:[%s1190_s20 + $0x30] sm:$0xff] %vm514_vm6, %v485_v2 }
 0x250   : > { %v487_v3 = vpop.f32.mrf.mxu2 }
 0x251   : > { %v488_v4 = vadd.f32 %v962_v52, %v487_v3 }
 0x253   : > { %522 = vst.msk [vmem:[%s1190_s20 + $0x38] sm:$0xff] %vm514_vm6, %v488_v4 }
 0x258   : > { %v490_v5 = vpop.f32.mrf.mxu2 }
 0x259   : > { %v491_v6 = vadd.f32 %v962_v52, %v490_v5 }
 0x25b   : > { %523 = vst.msk [vmem:[%s1190_s20 + $0x40] sm:$0xff] %vm514_vm6, %v491_v6 }
 0x260   : > { %v493_v7 = vpop.f32.mrf.mxu2 }
 0x261   : > { %v494_v8 = vadd.f32 %v962_v52, %v493_v7 }
 0x263   : > { %524 = vst.msk [vmem:[%s1190_s20 + $0x48] sm:$0xff] %vm514_vm6, %v494_v8 }
 0x268   : > { %v496_v9 = vpop.f32.mrf.mxu2 }
 0x269   : > { %v497_v10 = vadd.f32 %v962_v52, %v496_v9 }
 0x26b   : > { %525 = vst.msk [vmem:[%s1190_s20 + $0x50] sm:$0xff] %vm514_vm6, %v497_v10 }
 0x270   : > { %v499_v11 = vpop.f32.mrf.mxu2 }
 0x271   : > { %v500_v12 = vadd.f32 %v962_v52, %v499_v11 }
 0x273   : > { %526 = vst.msk [vmem:[%s1190_s20 + $0x58] sm:$0xff] %vm514_vm6, %v500_v12 }
 0x278   : > { %v502_v13 = vpop.f32.mrf.mxu2 }
 0x279   : > { %v503_v14 = vadd.f32 %v962_v52, %v502_v13 }
 0x27b   : > { %527 = vst.msk [vmem:[%s1190_s20 + $0x60] sm:$0xff] %vm514_vm6, %v503_v14 }
 0x280   : > { %v505_v15 = vpop.f32.mrf.mxu3 }
 0x281   : > { %v506_v16 = vadd.f32 %v962_v52, %v505_v15 }
 0x283   : > { %528 = vst.msk [vmem:[%s1190_s20 + $0x68] sm:$0xff] %vm514_vm6, %v506_v16 }
 0x288   : > { %v508_v17 = vpop.f32.mrf.mxu3 }
 0x289   : > { %v509_v18 = vadd.f32 %v962_v52, %v508_v17 }
 0x28b   : > { %529 = vst.msk [vmem:[%s1190_s20 + $0x70] sm:$0xff] %vm514_vm6, %v509_v18 }
 0x28f   : > { %537 = sbr.rel (!%p1111_p4) target bundleno = 708 (0x2c4), region = 44 }
 0x290   : > { %v511_v19 = vpop.f32.mrf.mxu3 }
 0x291   : > { %v512_v20 = vadd.f32 %v962_v52, %v511_v19 }
 0x293   : > { %530 = vst.msk [vmem:[%s1190_s20 + $0x78] sm:$0xff] %vm514_vm6, %v512_v20 }
 0x294   : > { %s1344_s18 = smov (!%p540_p8, %s539_s18), 16 }
 0x295   : > { %s851_s30 = sshll.u32 %s1344_s18, 3 }
 0x296   : > { %p854_p9 = scmp.eq.s32.totalorder %s851_s30, 0 }
 0x297   : > { %s1237_s6 = sshrl.u32 (!%p854_p9), %s1344_s18, 4 }
 0x298   : > { %548 = sbr.rel (%p854_p9) target bundleno = 708 (0x2c4), region = 48  ;;  %p855_p10 = scmp.le.s32.totalorder (!%p854_p9), %s1237_s6, 0 }
 0x29d   : > { %763 = sbr.rel (%p855_p10) target bundleno = 691 (0x2b3), region = 124  ;;  %s1335_s21 = smov (!%p855_p10), %s1231_s29 }
 0x29e   : > { %s1336_s26 = smov (!%p855_p10), %s1190_s20  ;;  %s1246_s27 = smov (!%p855_p10), 0  }
 0x29f   : > { %s1248_s7 = smov (!%p855_p10), 0  }
 0x2a2 LB: >> { %v641_v21 = vld [vmem:[%s1029_s26] sm:$0xff]  ;;  %v643_v22 = vld [vmem:[%s1029_s26 + $0x8] sm:$0xff]  ;;  %v645_v23 = vld [vmem:[%s1029_s26 + $0x10] sm:$0xff]  ;;  %s673_s8 = sadd.s32 1, %s1033_s27  ;;  %s635_s7 = sadd.s32 1, %s1037_s7   ;;  %s1037_s7 = sphi %s1248_s7, %s635_s7   ;;  %s1033_s27 = sphi %s1246_s27, %s1339_s27   ;;  %s1029_s26 = sphi %s1336_s26, %s1338_s26   ;;  %s1025_s21 = sphi %s1335_s21, %s1337_s21  }
 0x2a3   : >> { %642 = vst [vmem:[%s1025_s21] sm:$0xff] %v641_v21  ;;  %v647_v24 = vld [vmem:[%s1029_s26 + $0x18] sm:$0xff]  ;;  %p674_p11 = scmp.ge.s32.totalorder %s673_s8, %s1237_s6  ;;  %v649_v25 = vld [vmem:[%s1029_s26 + $0x20] sm:$0xff]  ;;  %v651_v26 = vld [vmem:[%s1029_s26 + $0x28] sm:$0xff]  ;;  %p634_p12 = scmp.ge.s32.totalorder %s635_s7, %s1237_s6 }
 0x2a4   : >> { %644 = vst [vmem:[%s1025_s21 + $0x8] sm:$0xff] %v643_v22  ;;  %v653_v27 = vld [vmem:[%s1029_s26 + $0x30] sm:$0xff]  ;;  %v655_v28 = vld [vmem:[%s1029_s26 + $0x38] sm:$0xff]  ;;  %v657_v29 = vld [vmem:[%s1029_s26 + $0x40] sm:$0xff] }
 0x2a5   : >> { %646 = vst [vmem:[%s1025_s21 + $0x10] sm:$0xff] %v645_v23  ;;  %s1346_s8 = smov (%p674_p11, %s673_s8), 0  ;;  %v659_v30 = vld [vmem:[%s1029_s26 + $0x48] sm:$0xff]  ;;  %v661_v31 = vld [vmem:[%s1029_s26 + $0x50] sm:$0xff]  ;;  %v663_v32 = vld [vmem:[%s1029_s26 + $0x58] sm:$0xff] }
 0x2a6   : >> { %648 = vst [vmem:[%s1025_s21 + $0x18] sm:$0xff] %v647_v24  ;;  %s856_s9 = sshll.u32 %s1346_s8, 7  ;;  %v665_v33 = vld [vmem:[%s1029_s26 + $0x60] sm:$0xff]  ;;  %v667_v34 = vld [vmem:[%s1029_s26 + $0x68] sm:$0xff]  ;;  %v669_v35 = vld [vmem:[%s1029_s26 + $0x70] sm:$0xff]  ;;  %s1339_s27 = smov %s1346_s8 }
 0x2a7   : >> { %650 = vst [vmem:[%s1025_s21 + $0x20] sm:$0xff] %v649_v25  ;;  %s678_s10 = scalar_lea.vmem %s1190_s20, %s856_s9 [#allocation2]   ;;  %s679_s11 = scalar_lea.vmem %s1231_s29, %s856_s9   ;;  %v671_v36 = vld [vmem:[%s1029_s26 + $0x78] sm:$0xff] }
 0x2a8   : >> { %652 = vst [vmem:[%s1025_s21 + $0x28] sm:$0xff] %v651_v26  ;;  %s1338_s26 = smov %s678_s10 }
 0x2a9   : >> { %654 = vst [vmem:[%s1025_s21 + $0x30] sm:$0xff] %v653_v27 }
 0x2aa   : >> { %656 = vst [vmem:[%s1025_s21 + $0x38] sm:$0xff] %v655_v28 }
 0x2ab   : >> { %658 = vst [vmem:[%s1025_s21 + $0x40] sm:$0xff] %v657_v29 }
 0x2ac   : >> { %660 = vst [vmem:[%s1025_s21 + $0x48] sm:$0xff] %v659_v30 }
 0x2ad   : >> { %662 = vst [vmem:[%s1025_s21 + $0x50] sm:$0xff] %v661_v31 }
 0x2ae   : >> { %664 = vst [vmem:[%s1025_s21 + $0x58] sm:$0xff] %v663_v32  ;;  %637 = sbr.rel (!%p634_p12) target bundleno = 674 (0x2a2), region = 130 }
 0x2af   : >> { %666 = vst [vmem:[%s1025_s21 + $0x60] sm:$0xff] %v665_v33 }
 0x2b0   : >> { %668 = vst [vmem:[%s1025_s21 + $0x68] sm:$0xff] %v667_v34 }
 0x2b1   : >> { %670 = vst [vmem:[%s1025_s21 + $0x70] sm:$0xff] %v669_v35 }
 0x2b2   : >> { %672 = vst [vmem:[%s1025_s21 + $0x78] sm:$0xff] %v671_v36  ;;  %s1337_s21 = smov %s679_s11 }
 0x2b3 PF: > { %s1310_s12 = sand.u32 15, %s1344_s18   ;;  %s867_s13 = sshll.u32 %s1237_s6, 7 }
 0x2b4   : > { %s684_s14 = scalar_lea.vmem %s1190_s20, %s867_s13 [#allocation2]   ;;  %s686_s15 = scalar_lea.vmem %s1231_s29, %s867_s13  }
 0x2b5   : > { %p861_p13 = scmp.le.s32.totalorder %s1310_s12, 0 }
 0x2b6   : > { %s1039_s16 = smov (!%p861_p13), %s686_s15   ;;  %s1043_s17 = smov (!%p861_p13), %s684_s14  }
 0x2b7   : > { %777 = sbr.rel (%p861_p13) target bundleno = 708 (0x2c4), region = 135  ;;  %s1047_s23 = smov (!%p861_p13), 0  }
 0x2b8   : > { %s1051_s24 = smov (!%p861_p13), 0  }
 0x2bc LB: >> { %v696_v37 = vld [vmem:[%s1045_s17] sm:$0xff]  ;;  %s698_s18 = sadd.s32 1, %s1049_s23  ;;  %s690_s24 = sadd.s32 1, %s1053_s24   ;;  %s1053_s24 = sphi %s1051_s24, %s690_s24   ;;  %s1049_s23 = sphi %s1047_s23, %s1048_s23   ;;  %s1045_s17 = sphi %s1043_s17, %s703_s17   ;;  %s1041_s16 = sphi %s1039_s16, %s704_s16  }
 0x2bd   : >> { %697 = vst [vmem:[%s1041_s16] sm:$0xff] %v696_v37  ;;  %p699_p0 = scmp.ge.s32.totalorder %s698_s18, %s1310_s12  ;;  %p689_p1 = scmp.ge.s32.totalorder %s690_s24, %s1310_s12 }
 0x2bf   : >> { %s1348_s18 = smov (%p699_p0, %s698_s18), 0  ;;  %692 = sbr.rel (!%p689_p1) target bundleno = 700 (0x2bc), region = 141 }
 0x2c0   : >> { %s862_s20 = sshll.u32 %s1348_s18, 3  ;;  %s1048_s23 = smov %s1348_s18  }
 0x2c1   : >> { %s703_s17 = scalar_lea.vmem %s684_s14, %s862_s20 [#allocation2]   ;;  %s704_s16 = scalar_lea.vmem %s686_s15, %s862_s20  }
 0x2c4 PF: > { %p12_p2 = scmp.ge.s32.totalorder %s1101_s22, 4   ;;  %s1340_s18 = smov %s1017_s19 }
 0x2c5   : > { %s1341_s19 = smov %s1109_s25  ;;  %s1342_s20 = smov %s1101_s22 }
 0x2c6   :  { %14 = sbr.rel (!%p12_p2) target bundleno = 2 (0x2), region = 152 }

</bundles_post_ra>
